<compile_context>
chip_gen: v5e
topology: v5e:2x2
jax: 0.10.0
libtpu: 0.0.40
codegen_flags: <defaults>
</compile_context>

<pallas_src>
import functools

import jax
import jax.numpy as jnp
from jax.experimental import pallas as pl
from jax.experimental.pallas import tpu as pltpu

_LANE = 128     # lane width (last dim)
_SUBLANE = 8    # f32 sublane width (second-to-last dim)


def _round_up(x, m):
    return (x + m - 1) // m * m


def ffn_kernel(x_ref, w1_ref, b1_ref, w2_ref, b2_ref, w3_ref, b3_ref, o_ref):
    x = x_ref[...]
    # layer1 + relu (bias add adjacent to the MXU pop -> hides under drain)
    h1 = jnp.dot(x, w1_ref[...], preferred_element_type=jnp.float32)
    h1 = jnp.maximum(h1 + b1_ref[...], 0.0)
    # layer2 + relu
    h2 = jnp.dot(h1, w2_ref[...], preferred_element_type=jnp.float32)
    h2 = jnp.maximum(h2 + b2_ref[...], 0.0)
    # layer3 (+ bias; padded out-columns carry ~-FLT_MAX bias so exp() -> 0)
    logits = jnp.dot(h2, w3_ref[...], preferred_element_type=jnp.float32) + b3_ref[...]
    # softmax over last dim in float32 (matches torch softmax(dtype=float32))
    m = jnp.max(logits, axis=-1, keepdims=True)
    e = jnp.exp(logits - m)
    denom = jnp.sum(e, axis=-1, keepdims=True)
    # exact reciprocal: approx=True would run on the EUP for free, but its
    # relative error can exceed the 1e-5 tolerance for softmax probabilities.
    o_ref[...] = (e * pl.reciprocal(denom, approx=False)).astype(o_ref.dtype)


@functools.partial(jax.jit, static_argnames=("tile_m",))
def feed_forward(x, w1, b1, w2, b2, w3, b3, *, tile_m=256):
    """x: [B, input_size]; w*: [in, out]; b*: [out]. Returns [B, output_size] f32."""
    B, in_size = x.shape
    hid = w1.shape[1]
    out_size = w3.shape[1]

    # ---- pad feature dims to the 128-lane width (lane-dense matmuls & stores)
    in_p = _round_up(in_size, _LANE)
    hid_p = _round_up(hid, _LANE)
    out_p = _round_up(out_size, _LANE)

    xp = jnp.pad(x.astype(jnp.float32), ((0, 0), (0, in_p - in_size)))
    w1p = jnp.pad(w1, ((0, in_p - in_size), (0, hid_p - hid)))
    w2p = jnp.pad(w2, ((0, hid_p - hid), (0, hid_p - hid)))
    w3p = jnp.pad(w3, ((0, hid_p - hid), (0, out_p - out_size)))
    b1p = jnp.pad(b1, (0, hid_p - hid)).reshape(1, hid_p)
    b2p = jnp.pad(b2, (0, hid_p - hid)).reshape(1, hid_p)
    # padded output columns get ~-FLT_MAX bias -> exp underflows to exactly 0,
    # so the softmax over out_p columns equals the softmax over out_size columns.
    neg = jnp.finfo(jnp.float32).min
    b3p = jnp.pad(b3, (0, out_p - out_size), constant_values=neg).reshape(1, out_p)

    # ---- pick the M (row) tile: big enough to amortize per-grid-step overhead
    # and fill the MXU M dimension, but never larger than the (padded) batch.
    b_pad8 = _round_up(B, _SUBLANE)
    tm = min(tile_m, b_pad8)
    tm = _round_up(tm, _SUBLANE)
    B_pad = _round_up(b_pad8, tm)
    if B_pad != B:
        xp = jnp.pad(xp, ((0, B_pad - B), (0, 0)))

    grid = (B_pad // tm,)

    # ---- advisory cost estimate for XLA scheduling around the custom call
    flops = 2 * B_pad * (in_p * hid_p + hid_p * hid_p + hid_p * out_p)
    transcendentals = B_pad * out_p                      # exp in the softmax
    bytes_accessed = 4 * (B_pad * in_p + B_pad * out_p
                          + in_p * hid_p + hid_p * hid_p + hid_p * out_p
                          + 2 * hid_p + out_p)
    cost = pl.CostEstimate(flops=flops,
                           transcendentals=transcendentals,
                           bytes_accessed=bytes_accessed)

    # ---- VMEM budget: 2x x/out tiles (double buffered), 2x weights (default
    # double buffering of the invariant blocks), biases, h1/h2 live values.
    # Capped at 64 MiB so the same budget is valid on v7x.
    vmem_est = 4 * (2 * tm * in_p + 2 * tm * out_p
                    + 2 * (in_p * hid_p + hid_p * hid_p + hid_p * out_p)
                    + 2 * hid_p + out_p
                    + 2 * tm * hid_p)
    vmem_limit = int(min(64 * 2**20, max(4 * 2**20, 2 * vmem_est)))

    out_padded = pl.pallas_call(
        ffn_kernel,
        out_shape=jax.ShapeDtypeStruct((B_pad, out_p), jnp.float32),
        grid_spec=pltpu.PrefetchScalarGridSpec(
            num_scalar_prefetch=0,
            grid=grid,
            in_specs=[
                pl.BlockSpec((tm, in_p), lambda i: (i, 0)),      # x tile (streams)
                pl.BlockSpec((in_p, hid_p), lambda i: (0, 0)),   # W1 (resident)
                pl.BlockSpec((1, hid_p), lambda i: (0, 0)),      # b1
                pl.BlockSpec((hid_p, hid_p), lambda i: (0, 0)),  # W2 (resident)
                pl.BlockSpec((1, hid_p), lambda i: (0, 0)),      # b2
                pl.BlockSpec((hid_p, out_p), lambda i: (0, 0)),  # W3 (resident)
                pl.BlockSpec((1, out_p), lambda i: (0, 0)),      # b3
            ],
            out_specs=pl.BlockSpec((tm, out_p), lambda i: (i, 0)),
        ),
        compiler_params=pltpu.CompilerParams(
            dimension_semantics=("parallel",),       # M axis shards across TCs
            vmem_limit_bytes=vmem_limit,
        ),
        cost_estimate=cost,
    )(xp, w1p, b1p, w2p, b2p, w3p, b3p)

    return out_padded[:B, :out_size]


def _ref_forward(x, w1, b1, w2, b2, w3, b3):
    h1 = jnp.maximum(x @ w1 + b1, 0.0)
    h2 = jnp.maximum(h1 @ w2 + b2, 0.0)
    logits = (h2 @ w3 + b3).astype(jnp.float32)
    return jax.nn.softmax(logits, axis=-1)


if __name__ == "__main__":
    key = jax.random.PRNGKey(0)

    # Deterministic param init mimicking nn.Linear's uniform(-1/sqrt(fan_in), 1/sqrt(fan_in)).
    def init_linear(kw, kb, fan_in, fan_out):
        bound = 1.0 / (fan_in ** 0.5)
        w = jax.random.uniform(kw, (fan_in, fan_out), jnp.float32, -bound, bound)
        b = jax.random.uniform(kb, (fan_out,), jnp.float32, -bound, bound)
        return w, b

    def run_case(case_key, B, input_size, hidden_size, output_size, tile_m):
        keys = jax.random.split(case_key, 7)
        x = jax.random.normal(keys[0], (B, input_size), dtype=jnp.float32)
        w1, b1 = init_linear(keys[1], keys[2], input_size, hidden_size)
        w2, b2 = init_linear(keys[3], keys[4], hidden_size, hidden_size)
        w3, b3 = init_linear(keys[5], keys[6], hidden_size, output_size)

        out = feed_forward(x, w1, b1, w2, b2, w3, b3, tile_m=tile_m)
        out = jax.block_until_ready(out)

        ref = _ref_forward(x, w1, b1, w2, b2, w3, b3)
        assert out.shape == (B, output_size)
        assert out.dtype == jnp.float32
        assert jnp.allclose(out, ref, atol=1e-5, rtol=1e-5)

    k1, k2 = jax.random.split(key)
    # Small demo shape (matches the module spec sizes): grid of 1.
    run_case(k1, 8, 32, 64, 32, 256)
    # Larger, non-multiple batch to exercise the tiled path: tile_m=256 ->
    # grid=(2,), lane-dense 128-wide padded features and batch padding/slicing.
    run_case(k2, 500, 32, 64, 32, 256)

    print("KERNEL_OK")
</pallas_src>

<mosaic_0001>
module attributes {stable_mosaic.version = 11 : i64} {
  func.func @ffn_kernel(%arg0: i32, %arg1: memref<8x128xf32, #tpu.memory_space<vmem>>, %arg2: memref<128x128xf32, #tpu.memory_space<vmem>>, %arg3: memref<1x128xf32, #tpu.memory_space<vmem>>, %arg4: memref<128x128xf32, #tpu.memory_space<vmem>>, %arg5: memref<1x128xf32, #tpu.memory_space<vmem>>, %arg6: memref<128x128xf32, #tpu.memory_space<vmem>>, %arg7: memref<1x128xf32, #tpu.memory_space<vmem>>, %arg8: memref<8x128xf32, #tpu.memory_space<vmem>>) attributes {dimension_semantics = [#tpu.dimension_semantics<parallel>], iteration_bounds = array<i64: 1>, scalar_prefetch = 0 : i64, scratch_operands = 0 : i64, tpu.core_type = #tpu.core_type<tc>, window_params = [{transform_indices = @transform_0, window_bounds = array<i64: 8, 128>}, {pipeline_mode = #tpu.pipeline_mode<synchronous>, transform_indices = @transform_1, window_bounds = array<i64: 128, 128>}, {pipeline_mode = #tpu.pipeline_mode<synchronous>, transform_indices = @transform_2, window_bounds = array<i64: 1, 128>}, {pipeline_mode = #tpu.pipeline_mode<synchronous>, transform_indices = @transform_3, window_bounds = array<i64: 128, 128>}, {pipeline_mode = #tpu.pipeline_mode<synchronous>, transform_indices = @transform_4, window_bounds = array<i64: 1, 128>}, {pipeline_mode = #tpu.pipeline_mode<synchronous>, transform_indices = @transform_5, window_bounds = array<i64: 128, 128>}, {pipeline_mode = #tpu.pipeline_mode<synchronous>, transform_indices = @transform_6, window_bounds = array<i64: 1, 128>}, {transform_indices = @transform_7, window_bounds = array<i64: 8, 128>}]} {
    %c0 = arith.constant 0 : index
    %c0_0 = arith.constant 0 : index
    %0 = vector.load %arg1[%c0, %c0_0] : memref<8x128xf32, #tpu.memory_space<vmem>>, vector<8x128xf32>
    %c0_1 = arith.constant 0 : index
    %c0_2 = arith.constant 0 : index
    %1 = vector.load %arg2[%c0_1, %c0_2] : memref<128x128xf32, #tpu.memory_space<vmem>>, vector<128x128xf32>
    %cst = arith.constant dense<0.000000e+00> : vector<8x128xf32>
    %2 = tpu.matmul %0, %1, %cst {dimension_numbers = #tpu.dot_dimension_numbers<[1], [0], [0], [1], [0, 0, 1, 1], [], []>} : vector<8x128xf32>, vector<128x128xf32>, vector<8x128xf32> -> vector<8x128xf32>
    %c0_3 = arith.constant 0 : index
    %c0_4 = arith.constant 0 : index
    %3 = vector.load %arg3[%c0_3, %c0_4] : memref<1x128xf32, #tpu.memory_space<vmem>>, vector<1x128xf32>
    %4 = vector.broadcast %3 : vector<1x128xf32> to vector<8x128xf32>
    %5 = arith.addf %2, %4 : vector<8x128xf32>
    %cst_5 = arith.constant 0.000000e+00 : f32
    %6 = vector.broadcast %cst_5 : f32 to vector<8x128xf32>
    %7 = arith.maximumf %5, %6 : vector<8x128xf32>
    %c0_6 = arith.constant 0 : index
    %c0_7 = arith.constant 0 : index
    %8 = vector.load %arg4[%c0_6, %c0_7] : memref<128x128xf32, #tpu.memory_space<vmem>>, vector<128x128xf32>
    %cst_8 = arith.constant dense<0.000000e+00> : vector<8x128xf32>
    %9 = tpu.matmul %7, %8, %cst_8 {dimension_numbers = #tpu.dot_dimension_numbers<[1], [0], [0], [1], [0, 0, 1, 1], [], []>} : vector<8x128xf32>, vector<128x128xf32>, vector<8x128xf32> -> vector<8x128xf32>
    %c0_9 = arith.constant 0 : index
    %c0_10 = arith.constant 0 : index
    %10 = vector.load %arg5[%c0_9, %c0_10] : memref<1x128xf32, #tpu.memory_space<vmem>>, vector<1x128xf32>
    %11 = vector.broadcast %10 : vector<1x128xf32> to vector<8x128xf32>
    %12 = arith.addf %9, %11 : vector<8x128xf32>
    %cst_11 = arith.constant 0.000000e+00 : f32
    %13 = vector.broadcast %cst_11 : f32 to vector<8x128xf32>
    %14 = arith.maximumf %12, %13 : vector<8x128xf32>
    %c0_12 = arith.constant 0 : index
    %c0_13 = arith.constant 0 : index
    %15 = vector.load %arg6[%c0_12, %c0_13] : memref<128x128xf32, #tpu.memory_space<vmem>>, vector<128x128xf32>
    %cst_14 = arith.constant dense<0.000000e+00> : vector<8x128xf32>
    %16 = tpu.matmul %14, %15, %cst_14 {dimension_numbers = #tpu.dot_dimension_numbers<[1], [0], [0], [1], [0, 0, 1, 1], [], []>} : vector<8x128xf32>, vector<128x128xf32>, vector<8x128xf32> -> vector<8x128xf32>
    %c0_15 = arith.constant 0 : index
    %c0_16 = arith.constant 0 : index
    %17 = vector.load %arg7[%c0_15, %c0_16] : memref<1x128xf32, #tpu.memory_space<vmem>>, vector<1x128xf32>
    %18 = vector.broadcast %17 : vector<1x128xf32> to vector<8x128xf32>
    %19 = arith.addf %16, %18 : vector<8x128xf32>
    %cst_17 = arith.constant dense<0xFF800000> : vector<8xf32>
    %20 = vector.multi_reduction <maximumf>, %19, %cst_17 [1] : vector<8x128xf32> to vector<8xf32>
    %21 = vector.shape_cast %20 : vector<8xf32> to vector<8x1xf32>
    %22 = vector.broadcast %21 : vector<8x1xf32> to vector<8x128xf32>
    %23 = arith.subf %19, %22 : vector<8x128xf32>
    %24 = math.exp %23 : vector<8x128xf32>
    %cst_18 = arith.constant dense<0.000000e+00> : vector<8xf32>
    %25 = vector.multi_reduction <add>, %24, %cst_18 [1] : vector<8x128xf32> to vector<8xf32>
    %26 = vector.shape_cast %25 : vector<8xf32> to vector<8x1xf32>
    %27 = tpu.reciprocal %26 : vector<8x1xf32> -> vector<8x1xf32>
    %28 = vector.broadcast %27 : vector<8x1xf32> to vector<8x128xf32>
    %29 = arith.mulf %24, %28 : vector<8x128xf32>
    %c0_19 = arith.constant 0 : index
    %c0_20 = arith.constant 0 : index
    %30 = vector.load %arg8[%c0_19, %c0_20] : memref<8x128xf32, #tpu.memory_space<vmem>>, vector<8x128xf32>
    tpu.vector_store %arg8[%c0_19, %c0_20], %29 {strides = array<i32>} : memref<8x128xf32, #tpu.memory_space<vmem>>, vector<8x128xf32>,
    return
  }
  func.func @transform_0(%arg0: i32) -> (i32, i32) {
    %c0_i32 = arith.constant 0 : i32
    %c0_i32_0 = arith.constant 0 : i32
    return %arg0, %c0_i32 : i32, i32
  }
  func.func @transform_1(%arg0: i32) -> (i32, i32) {
    %c0_i32 = arith.constant 0 : i32
    %c0_i32_0 = arith.constant 0 : i32
    %c0_i32_1 = arith.constant 0 : i32
    return %c0_i32, %c0_i32_0 : i32, i32
  }
  func.func @transform_2(%arg0: i32) -> (i32, i32) {
    %c0_i32 = arith.constant 0 : i32
    %c0_i32_0 = arith.constant 0 : i32
    %c0_i32_1 = arith.constant 0 : i32
    return %c0_i32, %c0_i32_0 : i32, i32
  }
  func.func @transform_3(%arg0: i32) -> (i32, i32) {
    %c0_i32 = arith.constant 0 : i32
    %c0_i32_0 = arith.constant 0 : i32
    %c0_i32_1 = arith.constant 0 : i32
    return %c0_i32, %c0_i32_0 : i32, i32
  }
  func.func @transform_4(%arg0: i32) -> (i32, i32) {
    %c0_i32 = arith.constant 0 : i32
    %c0_i32_0 = arith.constant 0 : i32
    %c0_i32_1 = arith.constant 0 : i32
    return %c0_i32, %c0_i32_0 : i32, i32
  }
  func.func @transform_5(%arg0: i32) -> (i32, i32) {
    %c0_i32 = arith.constant 0 : i32
    %c0_i32_0 = arith.constant 0 : i32
    %c0_i32_1 = arith.constant 0 : i32
    return %c0_i32, %c0_i32_0 : i32, i32
  }
  func.func @transform_6(%arg0: i32) -> (i32, i32) {
    %c0_i32 = arith.constant 0 : i32
    %c0_i32_0 = arith.constant 0 : i32
    %c0_i32_1 = arith.constant 0 : i32
    return %c0_i32, %c0_i32_0 : i32, i32
  }
  func.func @transform_7(%arg0: i32) -> (i32, i32) {
    %c0_i32 = arith.constant 0 : i32
    %c0_i32_0 = arith.constant 0 : i32
    return %arg0, %c0_i32 : i32, i32
  }
}

</mosaic_0001>

<bundles_post_ra>
// kernel: feed_forward.1
= control target key start
LH: loop header
LB: loop body
LE: loop exit
PB: predicated region body
PF: predicated region fallthrough
CT: control target
= control target key end

     0   :  { %s423_s0 = inlined_call_operand.vmem [shape: f32[8,128], index: 0, kind: input, shape index: {}]   ;;  %s424_s1 = inlined_call_operand.vmem [shape: f32[128,128], index: 1, kind: input, shape index: {}]   ;;  %s425_s2 = inlined_call_operand.vmem [shape: f32[1,128], index: 2, kind: input, shape index: {}]   ;;  %s426_s3 = inlined_call_operand.vmem [shape: f32[128,128], index: 3, kind: input, shape index: {}]   ;;  %s427_s4 = inlined_call_operand.vmem [shape: f32[1,128], index: 4, kind: input, shape index: {}]   ;;  %s428_s5 = inlined_call_operand.vmem [shape: f32[128,128], index: 5, kind: input, shape index: {}]   ;;  %s429_s6 = inlined_call_operand.vmem [shape: f32[1,128], index: 6, kind: input, shape index: {}]   ;;  %s430_s7 = inlined_call_operand.hbm [shape: f32[8,128], index: 7, kind: output, shape index: {}]  }
   0x1   :  { %v43_v0 = vld [vmem:[%s424_s1 + $0x78] sm:$0xff]  ;;  %v42_v1 = vld [vmem:[%s424_s1 + $0x70] sm:$0xff]  ;;  %v41_v2 = vld [vmem:[%s424_s1 + $0x68] sm:$0xff] }
   0x2   :  { %48 = vmatpush.msra.mxu0 %v43_v0  ;;  %v40_v3 = vld [vmem:[%s424_s1 + $0x60] sm:$0xff]  ;;  %v84_v4 = vld [vmem:[%s426_s3 + $0x78] sm:$0xff]  ;;  %v83_v6 = vld [vmem:[%s426_s3 + $0x70] sm:$0xff] }
   0x3   :  { %v39_v5 = vld [vmem:[%s424_s1 + $0x58] sm:$0xff]  ;;  %89 = vmatpush.msra.mxu1 %v84_v4  ;;  %v82_v7 = vld [vmem:[%s426_s3 + $0x68] sm:$0xff]  ;;  %v38_v8 = vld [vmem:[%s424_s1 + $0x50] sm:$0xff] }
   0x4   :  { %49 = vmatpush.msra.mxu0 %v42_v1  ;;  %v81_v9 = vld [vmem:[%s426_s3 + $0x60] sm:$0xff]  ;;  %v37_v10 = vld [vmem:[%s424_s1 + $0x48] sm:$0xff]  ;;  %v80_v11 = vld [vmem:[%s426_s3 + $0x58] sm:$0xff] }
   0x5   :  { %90 = vmatpush.msra.mxu1 %v83_v6 }
   0x6   :  { %50 = vmatpush.msra.mxu0 %v41_v2 }
   0x7   :  { %91 = vmatpush.msra.mxu1 %v82_v7 }
   0x8   :  { %51 = vmatpush.msra.mxu0 %v40_v3 }
   0xa   :  { %52 = vmatpush.msra.mxu0 %v39_v5 }
   0xc   :  { %53 = vmatpush.msra.mxu0 %v38_v8 }
   0xd   :  { %12 = vsyncpa [#allocation3], 0  ;;  %v36_v12 = vld [vmem:[%s424_s1 + $0x40] sm:$0xff]  ;;  %92 = vmatpush.msra.mxu1 %v81_v9  ;;  %v79_v13 = vld [vmem:[%s426_s3 + $0x50] sm:$0xff]  ;;  %s180_s30 = sshll.u32 %s430_s7, 4  ;;  %s181_s30 = int_to_ptr.hbm [resolvable:$true] %s180_s30 }
   0xe   :  { %54 = vmatpush.msra.mxu0 %v37_v10  ;;  %v35_v14 = vld [vmem:[%s424_s1 + $0x38] sm:$0xff]  ;;  %v78_v15 = vld [vmem:[%s426_s3 + $0x48] sm:$0xff]  ;;  %v34_v16 = vld [vmem:[%s424_s1 + $0x30] sm:$0xff] }
   0xf   :  { %93 = vmatpush.msra.mxu1 %v80_v11  ;;  %v77_v17 = vld [vmem:[%s426_s3 + $0x40] sm:$0xff]  ;;  %v33_v18 = vld [vmem:[%s424_s1 + $0x28] sm:$0xff]  ;;  %v76_v19 = vld [vmem:[%s426_s3 + $0x38] sm:$0xff] }
  0x10   :  { %55 = vmatpush.msra.mxu0 %v36_v12  ;;  %v32_v20 = vld [vmem:[%s424_s1 + $0x20] sm:$0xff]  ;;  %v75_v21 = vld [vmem:[%s426_s3 + $0x30] sm:$0xff]  ;;  %v31_v22 = vld [vmem:[%s424_s1 + $0x18] sm:$0xff] }
  0x11   :  { %94 = vmatpush.msra.mxu1 %v79_v13  ;;  %v74_v23 = vld [vmem:[%s426_s3 + $0x28] sm:$0xff]  ;;  %v30_v24 = vld [vmem:[%s424_s1 + $0x10] sm:$0xff]  ;;  %v73_v25 = vld [vmem:[%s426_s3 + $0x20] sm:$0xff] }
  0x12   :  { %56 = vmatpush.msra.mxu0 %v35_v14  ;;  %v29_v26 = vld [vmem:[%s424_s1 + $0x8] sm:$0xff]  ;;  %v72_v27 = vld [vmem:[%s426_s3 + $0x18] sm:$0xff]  ;;  %v28_v28 = vld [vmem:[%s424_s1] sm:$0xff] }
  0x13   :  { %95 = vmatpush.msra.mxu1 %v78_v15  ;;  %v27_v29 = vld [vmem:[%s423_s0] sm:$0xff]  ;;  %v71_v30 = vld [vmem:[%s426_s3 + $0x10] sm:$0xff]  ;;  %v70_v31 = vld [vmem:[%s426_s3 + $0x8] sm:$0xff] }
  0x14   :  { %57 = vmatpush.msra.mxu0 %v34_v16  ;;  %v69_v32 = vld [vmem:[%s426_s3] sm:$0xff]  ;;  %v125_v33 = vld [vmem:[%s428_s5 + $0x78] sm:$0xff]  ;;  %v124_v34 = vld [vmem:[%s428_s5 + $0x70] sm:$0xff] }
  0x15   :  { %96 = vmatpush.msra.mxu1 %v77_v17  ;;  %130 = vmatpush.msra.mxu2 %v125_v33  ;;  %v123_v35 = vld [vmem:[%s428_s5 + $0x68] sm:$0xff]  ;;  %v122_v36 = vld [vmem:[%s428_s5 + $0x60] sm:$0xff]  ;;  %v121_v37 = vld [vmem:[%s428_s5 + $0x58] sm:$0xff] }
  0x16   :  { %58 = vmatpush.msra.mxu0 %v33_v18  ;;  %v120_v38 = vld [vmem:[%s428_s5 + $0x50] sm:$0xff]  ;;  %v119_v39 = vld [vmem:[%s428_s5 + $0x48] sm:$0xff]  ;;  %v118_v40 = vld [vmem:[%s428_s5 + $0x40] sm:$0xff] }
  0x17   :  { %97 = vmatpush.msra.mxu1 %v76_v19  ;;  %131 = vmatpush.msra.mxu2 %v124_v34  ;;  %v117_v41 = vld [vmem:[%s428_s5 + $0x38] sm:$0xff]  ;;  %v116_v42 = vld [vmem:[%s428_s5 + $0x30] sm:$0xff]  ;;  %v115_v43 = vld [vmem:[%s428_s5 + $0x28] sm:$0xff] }
  0x18   :  { %59 = vmatpush.msra.mxu0 %v32_v20  ;;  %v114_v44 = vld [vmem:[%s428_s5 + $0x20] sm:$0xff]  ;;  %v113_v45 = vld [vmem:[%s428_s5 + $0x18] sm:$0xff]  ;;  %v112_v50 = vld [vmem:[%s428_s5 + $0x10] sm:$0xff] }
  0x19   :  { %98 = vmatpush.msra.mxu1 %v75_v21  ;;  %132 = vmatpush.msra.mxu2 %v123_v35  ;;  %v190_v46 = vld [vmem:[%s425_s2] ss:$0 sm:$0xff]  ;;  %v111_v51 = vld [vmem:[%s428_s5 + $0x8] sm:$0xff] }
  0x1a   :  { %60 = vmatpush.msra.mxu0 %v31_v22  ;;  %v110_v52 = vld [vmem:[%s428_s5] sm:$0xff] }
  0x1b   :  { %99 = vmatpush.msra.mxu1 %v74_v23  ;;  %133 = vmatpush.msra.mxu2 %v122_v36  ;;  %v191_v53 = vld [vmem:[%s427_s4] ss:$0 sm:$0xff]  ;;  %s223_s4 = smov [#allocation2]  }
  0x1c   :  { %61 = vmatpush.msra.mxu0 %v30_v24  ;;  %v192_v57 = vld [vmem:[%s429_s6] ss:$0 sm:$0xff]  ;;  %s178_s5 = sshll.u32 %s223_s4, 4  ;;  %s179_s5 = int_to_ptr.vmem [resolvable:$true] %s178_s5 }
  0x1d   :  { %100 = vmatpush.msra.mxu1 %v73_v25  ;;  %134 = vmatpush.msra.mxu2 %v121_v37 }
  0x1e   :  { %62 = vmatpush.msra.mxu0 %v29_v26 }
  0x1f   :  { %101 = vmatpush.msra.mxu1 %v72_v27  ;;  %135 = vmatpush.msra.mxu2 %v120_v38 }
  0x20   :  { %63 = vmatpush.msra.mxu0 %v28_v28 }
  0x21   :  { %64 = vmatmul.f32.vlgmr.msra.gmra.mxu0 %v27_v29  ;;  %102 = vmatpush.msra.mxu1 %v71_v30 }
  0x22   :  { %136 = vmatpush.msra.mxu2 %v119_v39 }
  0x23   :  { %103 = vmatpush.msra.mxu1 %v70_v31 }
  0x24   :  { %137 = vmatpush.msra.mxu2 %v118_v40 }
  0x25   :  { %104 = vmatpush.msra.mxu1 %v69_v32 }
  0x26   :  { %138 = vmatpush.msra.mxu2 %v117_v41 }
  0x28   :  { %139 = vmatpush.msra.mxu2 %v116_v42 }
  0x2a   :  { %140 = vmatpush.msra.mxu2 %v115_v43 }
  0x2c   :  { %141 = vmatpush.msra.mxu2 %v114_v44 }
  0x2e   :  { %142 = vmatpush.msra.mxu2 %v113_v45 }
  0x30   :  { %143 = vmatpush.msra.mxu2 %v112_v50 }
  0x32   :  { %144 = vmatpush.msra.mxu2 %v111_v51 }
  0x34   :  { %145 = vmatpush.msra.mxu2 %v110_v52 }
  0x9e   :  { %v65_v47 = vpop.f32.mrf.mxu0 }
  0x9f   :  { %v66_v48 = vadd.f32 %v190_v46, %v65_v47 }
  0xa1   :  { %v68_v49 = vmax.f32 %v66_v48, 0.0 }
  0xa3   :  { %105 = vmatmul.f32.vlgmr.msra.gmra.mxu1 %v68_v49 }
 0x120   :  { %v106_v54 = vpop.f32.mrf.mxu1 }
 0x121   :  { %v107_v55 = vadd.f32 %v191_v53, %v106_v54 }
 0x123   :  { %v109_v56 = vmax.f32 %v107_v55, 0.0 }
 0x125   :  { %146 = vmatmul.f32.vlgmr.msra.gmra.mxu2 %v109_v56 }
 0x1a8   :  { %v147_v58 = vpop.f32.mrf.mxu2 }
 0x1a9   :  { %v148_v59 = vadd.f32 %v192_v57, %v147_v58 }
 0x1ab   :  { %150 = vmax.xlane.f32.xlu0 %v148_v59 }
 0x21e   :  { %v151_v60 = vpop.xlane.xlu0 %150 }
 0x21f   :  { %v152_v61 = vsub.f32 %v148_v59, %v151_v60 }
 0x221   :  { %v153_v62 = vmul.f32 1.442695, %v152_v61 }
 0x223   :  { %193 = vpow2.f32 %v153_v62 }
 0x229   :  { %v194_v63 = vpop.eup %193 }
 0x22a   :  { %155 = vadd.xlane.f32.xlu0 %v194_v63 }
 0x29d   :  { %v156_v0 = vpop.xlane.xlu0 %155 }
 0x29e   :  { %195 = vrcp.f32 %v156_v0  ;;  %v168_v4 = vand.u32 2147483648, %v156_v0  ;;  %v166_v6 = vand.u32 2147483647, %v156_v0  ;;  %vm162_vm1 = vweird.f32 %v156_v0 }
 0x2a0   :  { %v169_v8 = vor.u32 1.1754944e-38, %v168_v4  ;;  %vm167_vm3 = vcmp.eq.f32.partialorder %v166_v6, 8.507059e+37 }
 0x2a4   :  { %v196_v1 = vpop.eup %195 }
 0x2a5   :  { %v158_v2 = vmul.f32 %v196_v1, %v156_v0  ;;  %vm163_vm0 = vweird.f32 %v196_v1 }
 0x2a6   :  { %vm164_vm2 = vmor %vm162_vm1, %vm163_vm0 }
 0x2a7   :  { %v159_v3 = vsub.f32 1.0, %v158_v2 }
 0x2a9   :  { %v160_v5 = vmul.f32 %v196_v1, %v159_v3 }
 0x2ab   :  { %v161_v7 = vadd.f32 %v196_v1, %v160_v5 }
 0x2ad   :  { %v165_v9 = vsel %vm164_vm2, %v196_v1, %v161_v7 }
 0x2ae   :  { %v170_v10 = vsel %vm167_vm3, %v169_v8, %v165_v9 }
 0x2af   :  { %v171_v11 = vmul.f32 %v194_v63, %v170_v10 }
 0x2b1   :  { %172 = vst [vmem:[#allocation2] sm:$0xff] %v171_v11 }
 0x2b2   :  { %183 = dma.vmem_to_hbm [thread:$0]  %s179_s5, 128, %s181_s30, [#allocation3]  }
 0x2b3   :  { %221 = dma.done.wait [#allocation3], 128  }
 0x2b4   :  { %222 = vsyncadd [#allocation3], 4294967168 }
 0x2b5   :  { %188 = vsyncpa [#allocation3], 1 }

</bundles_post_ra>
